<compile_context>
chip_gen: v7x
topology: tpu7x:2x2x1
jax: 0.10.0
libtpu: 0.0.40
codegen_flags: <defaults>
</compile_context>

<pallas_src>
import functools

import jax
import jax.numpy as jnp
from jax.experimental import pallas as pl
from jax.experimental.pallas import tpu as pltpu

_LANE = 128
_LANE_CANDIDATES = (32768, 16384, 8192, 4096, 2048, 1024, 512, 256, 128)


def _is_pow2(n: int) -> bool:
    return n > 0 and (n & (n - 1)) == 0


def _vmem_block_budget() -> int:
    """Per-step VMEM budget (bytes) for all double-buffered blocks + scratch."""
    try:
        kind = jax.devices()[0].device_kind.lower()
    except Exception:
        kind = ""
    # v6e/v7x default scoped-VMEM limit is 32 MiB -> 24 MiB of blocks leaves
    # headroom; everything else (v5e: 16 MiB default) gets a conservative 12 MiB.
    if "v6" in kind or "v7" in kind:
        return 24 * 1024 * 1024
    return 12 * 1024 * 1024


def _largest_div128(s: int, upper: int) -> int:
    """Largest multiple-of-128 divisor of s that is <= upper (s % 128 == 0)."""
    upper = min(s, max(_LANE, upper))
    best = _LANE
    d = _LANE
    while d <= upper:
        if s % d == 0:
            best = d
        d += _LANE
    return best


def _pick_rows_block(rows: int, lanes: int, per_elem_vmem: int, budget: int) -> int:
    """Row block: multiple of 8 (or == rows), sized to the VMEM budget."""
    if rows <= 8:
        return rows
    cap = (budget // (per_elem_vmem * lanes)) // 8 * 8
    cap = max(8, cap)
    return rows if cap >= rows else cap


# ----------------------------- kernels --------------------------------------

def _fpn_kernel(x_ref, o_ref, *, factor, nmax, scale, inv_factor, cmin, cmax):
    """divide=False: o = clamp(round(x*factor/nmax) / factor, cmin, cmax)."""
    x = x_ref[...].astype(jnp.float32)   # compute in f32 (no bf16 VPU on v5e)
    if scale is not None:                 # nmax power of two -> exact fused scale
        xr = jnp.round(x * scale)
    else:                                 # keep torch's (x*factor)/nmax exactly
        xr = jnp.round((x * factor) / nmax)
    o_ref[...] = jnp.clip(xr * inv_factor, cmin, cmax).astype(o_ref.dtype)


def _fpn_divide_kernel(x_ref, o_ref, xi_ref, *, factor, nmax, scale, inv_factor,
                       bits, low_border, high_border):
    """divide=True: innermost grid axis h selects upper (h==0) / lower (h==1).

    Shared work is done once at h==0 and the int value is carried in VMEM
    scratch for h==1, so the VPU work per output byte is not duplicated and the
    input block (whose index_map ignores h) is consumed only once.
    Clamp is omitted: after the border masks |upper|,|lower| <= 2**bits - 1, so
    value * inv_factor is already inside [-1, 1 - inv_factor].
    """
    h = pl.program_id(2)

    @pl.when(h == 0)
    def _():
        x = x_ref[...].astype(jnp.float32)
        if scale is not None:
            xr = jnp.round(x * scale)
        else:
            xr = jnp.round((x * factor) / nmax)
        # TODO(synk): torch casts to int8 here; int8 wrap-around for
        #             |round(x*factor/nmax)| > 127 is not reproduced (int32 used).
        xi = xr.astype(jnp.int32)
        xi_ref[...] = xi
        upper = (jnp.abs(xi) & high_border) >> bits
        upper = jnp.where(xi < 0, -upper, upper).astype(jnp.float32)  # copysign
        o_ref[...] = (upper * inv_factor).astype(o_ref.dtype)

    @pl.when(h != 0)
    def _():
        xi = xi_ref[...]
        lower = jnp.abs(xi) & low_border
        lower = jnp.where(xi < 0, -lower, lower).astype(jnp.float32)  # copysign
        o_ref[...] = (lower * inv_factor).astype(o_ref.dtype)


# ----------------------------- wrapper ---------------------------------------

def fixed_point_normalize(x, normalize_bits=8, normalize_max=256,
                          divide=False, override_max=False):
    """Pallas implementation of FixedPointNormalizer.forward for NCHW input."""
    bits = normalize_bits - 1
    nmax = normalize_max
    low_border = high_border = 0
    if divide:
        # torch only defines borders for even normalize_bits; odd + divide
        # would crash in torch as well.
        assert normalize_bits % 2 == 0, "divide=True requires even normalize_bits"
        bits = normalize_bits // 2 - 1
        low_border = 2 ** bits - 1
        high_border = low_border << bits
        if not override_max:
            nmax = high_border
    factor = 2.0 ** bits
    inv_factor = 1.0 / factor                       # power of two -> exact
    cmin, cmax = -1.0, 1.0 - inv_factor
    # Fused scale only when exact (nmax a power of two); else keep torch's
    # two-step (x*factor)/nmax to preserve round-half-even boundaries.
    scale = (factor / float(nmax)) if _is_pow2(int(nmax)) else None

    N, C, H, W = x.shape
    in_item = jnp.dtype(x.dtype).itemsize
    budget = _vmem_block_budget()

    if not divide:
        total = N * C * H * W
        total_pad = pl.cdiv(total, _LANE) * _LANE
        xf = x.reshape(-1)
        if total_pad != total:
            # TODO(synk): lane-ragged total -> one cheap pad + output slice
            #             instead of masked partial stores in the kernel.
            xf = jnp.pad(xf, (0, total_pad - total))
        lanes = next(c for c in _LANE_CANDIDATES if total_pad % c == 0)
        rows = total_pad // lanes
        x2 = xf.reshape(rows, lanes)

        per_elem = 2 * in_item + 2 * in_item        # in + out, double-buffered
        bn = _pick_rows_block(rows, lanes, per_elem, budget)
        grid = (pl.cdiv(rows, bn),)

        out = pl.pallas_call(
            functools.partial(_fpn_kernel, factor=factor, nmax=float(nmax),
                              scale=scale, inv_factor=inv_factor,
                              cmin=cmin, cmax=cmax),
            out_shape=jax.ShapeDtypeStruct((rows, lanes), x.dtype),
            grid=grid,
            in_specs=[pl.BlockSpec((bn, lanes), lambda i: (i, 0))],
            out_specs=pl.BlockSpec((bn, lanes), lambda i: (i, 0)),
            compiler_params=pltpu.CompilerParams(
                dimension_semantics=("parallel",)),
        )(x2)
        out = out.reshape(-1)
        if total_pad != total:
            out = out[:total]
        return out.reshape(N, C, H, W)

    # ----- divide=True -----
    out_dtype = jnp.float32  # torch.copysign on int tensors promotes to float32
    S = C * H * W
    S_pad = pl.cdiv(S, _LANE) * _LANE
    x2 = x.reshape(N, S)
    if S_pad != S:
        # One cheap pad of the input beats a full extra HBM pass (concatenate)
        # and keeps the store path lane-dense; the output is sliced back below.
        x2 = jnp.pad(x2, ((0, 0), (0, S_pad - S)))

    # VMEM per element: input + one output half (double-buffered) + int32 scratch.
    per_elem = 2 * in_item + 2 * 4 + 4
    elems_cap = max(_LANE, budget // per_elem)
    bn_floor = N if N < 8 else 8
    bs = _largest_div128(S_pad, elems_cap // bn_floor)
    bn = N if N * bs <= elems_cap else max(8, (elems_cap // bs) // 8 * 8)
    gs = S_pad // bs
    grid = (pl.cdiv(N, bn), gs, 2)

    kern = functools.partial(
        _fpn_divide_kernel, factor=factor, nmax=float(nmax), scale=scale,
        inv_factor=inv_factor, bits=bits,
        low_border=low_border, high_border=high_border)

    out = pl.pallas_call(
        kern,
        out_shape=jax.ShapeDtypeStruct((N, 2 * S_pad), out_dtype),
        grid=grid,
        # Input block index ignores h -> Pallas keeps the resident buffer for
        # the h==1 step (no second HBM fetch); the kernel only reads it at h==0.
        in_specs=[pl.BlockSpec((bn, bs), lambda i, j, h: (i, j))],
        out_specs=pl.BlockSpec((bn, bs), lambda i, j, h: (i, h * gs + j)),
        scratch_shapes=[pltpu.VMEM((bn, bs), jnp.int32)],
        compiler_params=pltpu.CompilerParams(
            dimension_semantics=("parallel", "parallel", "arbitrary")),
    )(x2)

    out = out.reshape(N, 2, S_pad)
    if S_pad != S:
        out = out[:, :, :S]
    # (N, 2, S) already has torch.cat((upper, lower), dim=1) memory layout.
    return out.reshape(N, 2 * C, H, W)


# ----------------------------- reference (plain JAX) -------------------------

def _reference(x, normalize_bits=8, normalize_max=256, divide=False,
               override_max=False):
    bits = normalize_bits - 1
    nmax = normalize_max
    low_border = high_border = 0
    if divide and normalize_bits % 2 == 0:
        bits = normalize_bits // 2 - 1
        low_border = 2 ** bits - 1
        high_border = low_border << bits
        if not override_max:
            nmax = high_border
    factor = 2.0 ** bits
    y = jnp.round(x.astype(jnp.float32) * factor / nmax)
    if divide:
        yi = y.astype(jnp.int32)
        yabs = jnp.abs(yi)
        lower = yabs & low_border
        upper = (yabs & high_border) >> bits
        lower = jnp.where(yi < 0, -lower, lower).astype(jnp.float32)
        upper = jnp.where(yi < 0, -upper, upper).astype(jnp.float32)
        y = jnp.concatenate([upper, lower], axis=1)
    y = y / factor
    return jnp.clip(y, -1.0, 1.0 - 1.0 / factor)


# ----------------------------- main ------------------------------------------

if __name__ == "__main__":
    key = jax.random.PRNGKey(0)
    x = jax.random.normal(key, (2, 4, 16, 16), dtype=jnp.float32) * 200.0

    # jit so the wrapper-side reshapes fuse into free bitcasts around the kernel.
    fpn_plain = jax.jit(functools.partial(
        fixed_point_normalize, normalize_bits=8, normalize_max=256, divide=False))
    fpn_divide = jax.jit(functools.partial(
        fixed_point_normalize, normalize_bits=8, normalize_max=256, divide=True))

    # Default config: normalize_bits=8, normalize_max=256, divide=False
    y = jax.block_until_ready(fpn_plain(x))
    y_ref = _reference(x, normalize_bits=8, normalize_max=256, divide=False)
    assert y.shape == (2, 4, 16, 16)
    assert jnp.allclose(y, y_ref, atol=1e-6), "divide=False mismatch"

    # divide=True config (even bits -> upper/lower halves, 2x channels)
    y2 = jax.block_until_ready(fpn_divide(x))
    y2_ref = _reference(x, normalize_bits=8, normalize_max=256, divide=True)
    assert y2.shape == (2, 8, 16, 16)
    assert jnp.allclose(y2, y2_ref, atol=1e-6), "divide=True mismatch"

    print("KERNEL_OK")
</pallas_src>

<mosaic_0001>
module attributes {stable_mosaic.version = 11 : i64} {
  func.func @_fpn_kernel(%arg0: i32, %arg1: memref<1x2048xf32, #tpu.memory_space<vmem>>, %arg2: memref<1x2048xf32, #tpu.memory_space<vmem>>) attributes {dimension_semantics = [#tpu.dimension_semantics<parallel>], iteration_bounds = array<i64: 1>, scalar_prefetch = 0 : i64, scratch_operands = 0 : i64, tpu.core_type = #tpu.core_type<tc>, window_params = [{transform_indices = @transform_0, window_bounds = array<i64: 1, 2048>}, {transform_indices = @transform_1, window_bounds = array<i64: 1, 2048>}]} {
    %c0 = arith.constant 0 : index
    %c0_0 = arith.constant 0 : index
    %0 = vector.load %arg1[%c0, %c0_0] : memref<1x2048xf32, #tpu.memory_space<vmem>>, vector<1x2048xf32>
    %cst = arith.constant 5.000000e-01 : f32
    %1 = vector.broadcast %cst : f32 to vector<1x2048xf32>
    %2 = arith.mulf %0, %1 : vector<1x2048xf32>
    %3 = math.roundeven %2 : vector<1x2048xf32>
    %cst_1 = arith.constant 7.812500e-03 : f32
    %4 = vector.broadcast %cst_1 : f32 to vector<1x2048xf32>
    %5 = arith.mulf %3, %4 : vector<1x2048xf32>
    %cst_2 = arith.constant -1.000000e+00 : f32
    %cst_3 = arith.constant 0.9921875 : f32
    %6 = vector.broadcast %cst_2 : f32 to vector<1x2048xf32>
    %7 = arith.maximumf %6, %5 : vector<1x2048xf32>
    %8 = vector.broadcast %cst_3 : f32 to vector<1x2048xf32>
    %9 = arith.minimumf %8, %7 : vector<1x2048xf32>
    %c0_4 = arith.constant 0 : index
    %c0_5 = arith.constant 0 : index
    %10 = vector.load %arg2[%c0_4, %c0_5] : memref<1x2048xf32, #tpu.memory_space<vmem>>, vector<1x2048xf32>
    tpu.vector_store %arg2[%c0_4, %c0_5], %9 {strides = array<i32>} : memref<1x2048xf32, #tpu.memory_space<vmem>>, vector<1x2048xf32>,
    return
  }
  func.func @transform_0(%arg0: i32) -> (i32, i32) {
    %c0_i32 = arith.constant 0 : i32
    %c0_i32_0 = arith.constant 0 : i32
    return %arg0, %c0_i32 : i32, i32
  }
  func.func @transform_1(%arg0: i32) -> (i32, i32) {
    %c0_i32 = arith.constant 0 : i32
    %c0_i32_0 = arith.constant 0 : i32
    return %arg0, %c0_i32 : i32, i32
  }
}

</mosaic_0001>

<bundles_post_ra>
// kernel: fixed_point_normalize.1
= control target key start
LH: loop header
LB: loop body
LE: loop exit
PB: predicated region body
PF: predicated region fallthrough
CT: control target
= control target key end

     0   :  { %s50_s0 = inlined_call_operand.vmem [shape: f32[1,2048], index: 0, kind: input, shape index: {}]   ;;  %s51_s1 = inlined_call_operand.vmem [shape: f32[1,2048], index: 1, kind: output, shape index: {}]  }
   0x1   :  { %v8_v0 = vld [vmem:[%s50_s0] sm:$0xff]  ;;  %v9_v1 = vld [vmem:[%s50_s0 + $0x8] sm:$0xff] }
   0x2   :  { %v10_v2 = vmul.f32 0.5, %v8_v0  ;;  %v11_v3 = vmul.f32 0.5, %v9_v1 }
   0x4   :  { %v26_v4 = vround.rtne.f32 %v10_v2  ;;  %v27_v5 = vround.rtne.f32 %v11_v3 }
   0x6   :  { %v14_v6 = vmul.f32 0.0078125, %v26_v4  ;;  %v15_v7 = vmul.f32 0.0078125, %v27_v5 }
   0x8   :  { %v16_v8 = vmax.f32 %v14_v6, -1.0  ;;  %v17_v9 = vmax.f32 %v15_v7, -1.0 }
   0xa   :  { %v18_v10 = vmin.f32 %v16_v8, 0.9921875  ;;  %v19_v11 = vmin.f32 %v17_v9, 0.9921875 }
   0xc   :  { %20 = vst [vmem:[%s51_s1] sm:$0xff] %v18_v10  ;;  %21 = vst [vmem:[%s51_s1 + $0x8] sm:$0xff] %v19_v11 }

</bundles_post_ra>
